<compile_context>
chip_gen: v7x
topology: tpu7x:2x2x1
jax: 0.10.0
libtpu: 0.0.40
codegen_flags: <defaults>
</compile_context>

<pallas_src>
import functools

import jax
import jax.numpy as jnp
from jax.experimental import pallas as pl
from jax.experimental.pallas import tpu as pltpu


def _gru_kernel(x_ref, h_ref, wx_ref, whrz_ref, whh_ref, b_ref, out_ref):
    """One batch tile of the GRU cell update.

    x_ref:    (tb, I)
    h_ref:    (tb, H)
    wx_ref:   (I, 3H)   = [W_i2r | W_i2z | W_i2h]
    whrz_ref: (H, 2H)   = [W_h2r | W_h2z]
    whh_ref:  (H, H)
    b_ref:    (1, 3H)   = [b_r | b_z | b_h]
    out_ref:  (tb, H)
    """
    H = h_ref.shape[1]

    x = x_ref[...]
    h = h_ref[...]

    # Two wide MXU passes instead of five narrow ones; accumulate in f32.
    gx = jnp.dot(x, wx_ref[...], preferred_element_type=jnp.float32)
    gx = gx + b_ref[...].astype(jnp.float32)
    gh = jnp.dot(h, whrz_ref[...], preferred_element_type=jnp.float32)

    # Gate pre-activations (slices are H-aligned -> lane-aligned for H % 128 == 0).
    r = jax.nn.sigmoid(gx[:, :H] + gh[:, :H])
    z = jax.nn.sigmoid(gx[:, H:2 * H] + gh[:, H:])

    h_f32 = h.astype(jnp.float32)
    hr = (h_f32 * r).astype(whh_ref.dtype)          # reset BEFORE the matmul (module spec)
    hp = jnp.tanh(gx[:, 2 * H:]
                  + jnp.dot(hr, whh_ref[...], preferred_element_type=jnp.float32))

    out_ref[...] = ((1.0 - z) * hp + z * h_f32).astype(out_ref.dtype)


def _pick_batch_tile(batch, requested=None):
    """Largest batch tile that divides B and satisfies the sublane rule."""
    if requested is not None and batch % requested == 0 and (
            requested % 8 == 0 or requested == batch):
        return requested
    for tb in (512, 256, 128, 64, 32, 16, 8):
        if batch % tb == 0:
            return tb
    return batch  # full-dim block is always legal


@functools.partial(jax.jit, static_argnames=("block_b",))
def gru_cell_forward(x, h, params, *, block_b=None):
    """One GRU cell step. x: (B, I), h: (B, H) -> new h: (B, H)."""
    B, I = x.shape
    H = h.shape[1]
    tb = _pick_batch_tile(B, block_b)

    # Host-side gate-weight fusion (under jit these concats hoist/fuse; for a
    # sequence loop they should be precomputed once outside the step).
    w_x = jnp.concatenate([params["W_i2r"], params["W_i2z"], params["W_i2h"]], axis=1)  # (I, 3H)
    w_hrz = jnp.concatenate([params["W_h2r"], params["W_h2z"]], axis=1)                 # (H, 2H)
    w_hh = params["W_h2h"]                                                              # (H, H)
    b_all = jnp.concatenate([params["b_r"], params["b_z"], params["b_h"]]).reshape(1, 3 * H)

    dtype_bytes = jnp.dtype(x.dtype).itemsize
    cost = pl.CostEstimate(
        flops=2 * B * (I * 3 * H + H * 2 * H + H * H) + 8 * B * H,
        transcendentals=3 * B * H,
        bytes_accessed=dtype_bytes * (B * I + 2 * B * H + I * 3 * H + H * 3 * H + 3 * H),
    )

    return pl.pallas_call(
        _gru_kernel,
        out_shape=jax.ShapeDtypeStruct((B, H), h.dtype),
        grid=(B // tb,),
        in_specs=[
            pl.BlockSpec((tb, I), lambda i: (i, 0)),          # x  : batch-tiled
            pl.BlockSpec((tb, H), lambda i: (i, 0)),          # h  : batch-tiled
            pl.BlockSpec((I, 3 * H), lambda i: (0, 0)),       # W_x   : VMEM-resident
            pl.BlockSpec((H, 2 * H), lambda i: (0, 0)),       # W_hrz : VMEM-resident
            pl.BlockSpec((H, H), lambda i: (0, 0)),           # W_h2h : VMEM-resident
            pl.BlockSpec((1, 3 * H), lambda i: (0, 0)),       # biases
        ],
        out_specs=pl.BlockSpec((tb, H), lambda i: (i, 0)),
        compiler_params=pltpu.CompilerParams(
            dimension_semantics=("parallel",),                # shard batch across TCs (v7x)
        ),
        cost_estimate=cost,
    )(x, h, w_x, w_hrz, w_hh, b_all)


def init_params(key, input_size, hidden_size, dtype=jnp.float32):
    """Deterministic synthetic init matching the PyTorch parameter shapes.

    (xavier-normal / orthogonal inits are approximated with scaled normals;
    forward semantics don't depend on the exact init scheme.)
    """
    ks = jax.random.split(key, 6)
    xav = (2.0 / (input_size + hidden_size)) ** 0.5
    inv_sqrt_h = 1.0 / (hidden_size ** 0.5)
    return {
        "W_i2r": xav * jax.random.normal(ks[0], (input_size, hidden_size), dtype),
        "W_h2r": inv_sqrt_h * jax.random.normal(ks[1], (hidden_size, hidden_size), dtype),
        "b_r": jnp.zeros((hidden_size,), dtype),
        "W_i2z": xav * jax.random.normal(ks[2], (input_size, hidden_size), dtype),
        "W_h2z": inv_sqrt_h * jax.random.normal(ks[3], (hidden_size, hidden_size), dtype),
        "b_z": jnp.zeros((hidden_size,), dtype),
        "W_i2h": xav * jax.random.normal(ks[4], (input_size, hidden_size), dtype),
        "W_h2h": inv_sqrt_h * jax.random.normal(ks[5], (hidden_size, hidden_size), dtype),
        "b_h": jnp.zeros((hidden_size,), dtype),
    }


def gru_cell_reference(x, h, params):
    """Pure-JAX reference mirroring the PyTorch module forward exactly."""
    c_input = jnp.concatenate([x, h], axis=1)
    w_r = jnp.concatenate([params["W_i2r"], params["W_h2r"]], axis=0)
    w_z = jnp.concatenate([params["W_i2z"], params["W_h2z"]], axis=0)
    r = jax.nn.sigmoid(c_input @ w_r + params["b_r"])
    z = jax.nn.sigmoid(c_input @ w_z + params["b_z"])
    hp = jnp.tanh(x @ params["W_i2h"] + (h * r) @ params["W_h2h"] + params["b_h"])
    return (1.0 - z) * hp + z * h


if __name__ == "__main__":
    batch = 128          # small, but >1 batch tile so the grid/pipeline is exercised
    input_size = 64
    hidden_size = 128    # multiple of 128 -> lane-dense gate slices & stores

    key = jax.random.PRNGKey(0)
    k_p, k_x, k_h = jax.random.split(key, 3)
    params = init_params(k_p, input_size, hidden_size)
    x = jax.random.normal(k_x, (batch, input_size), jnp.float32)
    h0 = jax.random.normal(k_h, (batch, hidden_size), jnp.float32)

    h_new = gru_cell_forward(x, h0, params, block_b=64)   # grid = (2,)
    h_new = jax.block_until_ready(h_new)

    h_ref = gru_cell_reference(x, h0, params)
    assert h_new.shape == (batch, hidden_size)
    assert jnp.allclose(h_new, h_ref, atol=1e-5, rtol=1e-5), "mismatch vs reference"

    print("KERNEL_OK")
</pallas_src>

<mosaic_0001>
module attributes {stable_mosaic.version = 11 : i64} {
  func.func @_gru_kernel(%arg0: i32, %arg1: memref<64x64xf32, #tpu.memory_space<vmem>>, %arg2: memref<64x128xf32, #tpu.memory_space<vmem>>, %arg3: memref<64x384xf32, #tpu.memory_space<vmem>>, %arg4: memref<128x256xf32, #tpu.memory_space<vmem>>, %arg5: memref<128x128xf32, #tpu.memory_space<vmem>>, %arg6: memref<1x384xf32, #tpu.memory_space<vmem>>, %arg7: memref<64x128xf32, #tpu.memory_space<vmem>>) attributes {dimension_semantics = [#tpu.dimension_semantics<parallel>], iteration_bounds = array<i64: 2>, scalar_prefetch = 0 : i64, scratch_operands = 0 : i64, tpu.core_type = #tpu.core_type<tc>, window_params = [{transform_indices = @transform_0, window_bounds = array<i64: 64, 64>}, {transform_indices = @transform_1, window_bounds = array<i64: 64, 128>}, {pipeline_mode = #tpu.pipeline_mode<synchronous>, transform_indices = @transform_2, window_bounds = array<i64: 64, 384>}, {pipeline_mode = #tpu.pipeline_mode<synchronous>, transform_indices = @transform_3, window_bounds = array<i64: 128, 256>}, {pipeline_mode = #tpu.pipeline_mode<synchronous>, transform_indices = @transform_4, window_bounds = array<i64: 128, 128>}, {pipeline_mode = #tpu.pipeline_mode<synchronous>, transform_indices = @transform_5, window_bounds = array<i64: 1, 384>}, {transform_indices = @transform_6, window_bounds = array<i64: 64, 128>}]} {
    %c0 = arith.constant 0 : index
    %c0_0 = arith.constant 0 : index
    %0 = vector.load %arg1[%c0, %c0_0] : memref<64x64xf32, #tpu.memory_space<vmem>>, vector<64x64xf32>
    %c0_1 = arith.constant 0 : index
    %c0_2 = arith.constant 0 : index
    %1 = vector.load %arg2[%c0_1, %c0_2] : memref<64x128xf32, #tpu.memory_space<vmem>>, vector<64x128xf32>
    %c0_3 = arith.constant 0 : index
    %c0_4 = arith.constant 0 : index
    %2 = vector.load %arg3[%c0_3, %c0_4] : memref<64x384xf32, #tpu.memory_space<vmem>>, vector<64x384xf32>
    %cst = arith.constant dense<0.000000e+00> : vector<64x384xf32>
    %3 = tpu.matmul %0, %2, %cst {dimension_numbers = #tpu.dot_dimension_numbers<[1], [0], [0], [1], [0, 0, 1, 1], [], []>} : vector<64x64xf32>, vector<64x384xf32>, vector<64x384xf32> -> vector<64x384xf32>
    %c0_5 = arith.constant 0 : index
    %c0_6 = arith.constant 0 : index
    %4 = vector.load %arg6[%c0_5, %c0_6] : memref<1x384xf32, #tpu.memory_space<vmem>>, vector<1x384xf32>
    %5 = vector.broadcast %4 : vector<1x384xf32> to vector<64x384xf32>
    %6 = arith.addf %3, %5 : vector<64x384xf32>
    %c0_7 = arith.constant 0 : index
    %c0_8 = arith.constant 0 : index
    %7 = vector.load %arg4[%c0_7, %c0_8] : memref<128x256xf32, #tpu.memory_space<vmem>>, vector<128x256xf32>
    %cst_9 = arith.constant dense<0.000000e+00> : vector<64x256xf32>
    %8 = tpu.matmul %1, %7, %cst_9 {dimension_numbers = #tpu.dot_dimension_numbers<[1], [0], [0], [1], [0, 0, 1, 1], [], []>} : vector<64x128xf32>, vector<128x256xf32>, vector<64x256xf32> -> vector<64x256xf32>
    %9 = vector.extract_strided_slice %6 {offsets = [0, 0], sizes = [64, 128], strides = [1, 1]} : vector<64x384xf32> to vector<64x128xf32>
    %10 = vector.extract_strided_slice %8 {offsets = [0, 0], sizes = [64, 128], strides = [1, 1]} : vector<64x256xf32> to vector<64x128xf32>
    %11 = arith.addf %9, %10 : vector<64x128xf32>
    %12 = arith.negf %11 : vector<64x128xf32>
    %13 = math.exp %12 : vector<64x128xf32>
    %cst_10 = arith.constant 1.000000e+00 : f32
    %14 = vector.broadcast %cst_10 : f32 to vector<64x128xf32>
    %15 = arith.addf %14, %13 : vector<64x128xf32>
    %16 = arith.divf %14, %15 : vector<64x128xf32>
    %17 = vector.extract_strided_slice %6 {offsets = [0, 128], sizes = [64, 128], strides = [1, 1]} : vector<64x384xf32> to vector<64x128xf32>
    %18 = vector.extract_strided_slice %8 {offsets = [0, 128], sizes = [64, 128], strides = [1, 1]} : vector<64x256xf32> to vector<64x128xf32>
    %19 = arith.addf %17, %18 : vector<64x128xf32>
    %20 = arith.negf %19 : vector<64x128xf32>
    %21 = math.exp %20 : vector<64x128xf32>
    %cst_11 = arith.constant 1.000000e+00 : f32
    %22 = vector.broadcast %cst_11 : f32 to vector<64x128xf32>
    %23 = arith.addf %22, %21 : vector<64x128xf32>
    %24 = arith.divf %22, %23 : vector<64x128xf32>
    %25 = arith.mulf %1, %16 : vector<64x128xf32>
    %26 = vector.extract_strided_slice %6 {offsets = [0, 256], sizes = [64, 128], strides = [1, 1]} : vector<64x384xf32> to vector<64x128xf32>
    %c0_12 = arith.constant 0 : index
    %c0_13 = arith.constant 0 : index
    %27 = vector.load %arg5[%c0_12, %c0_13] : memref<128x128xf32, #tpu.memory_space<vmem>>, vector<128x128xf32>
    %cst_14 = arith.constant dense<0.000000e+00> : vector<64x128xf32>
    %28 = tpu.matmul %25, %27, %cst_14 {dimension_numbers = #tpu.dot_dimension_numbers<[1], [0], [0], [1], [0, 0, 1, 1], [], []>} : vector<64x128xf32>, vector<128x128xf32>, vector<64x128xf32> -> vector<64x128xf32>
    %29 = arith.addf %26, %28 : vector<64x128xf32>
    %30 = math.tanh %29 : vector<64x128xf32>
    %cst_15 = arith.constant 1.000000e+00 : f32
    %31 = vector.broadcast %cst_15 : f32 to vector<64x128xf32>
    %32 = arith.subf %31, %24 : vector<64x128xf32>
    %33 = arith.mulf %32, %30 : vector<64x128xf32>
    %34 = arith.mulf %24, %1 : vector<64x128xf32>
    %35 = arith.addf %33, %34 : vector<64x128xf32>
    %c0_16 = arith.constant 0 : index
    %c0_17 = arith.constant 0 : index
    %36 = vector.load %arg7[%c0_16, %c0_17] : memref<64x128xf32, #tpu.memory_space<vmem>>, vector<64x128xf32>
    tpu.vector_store %arg7[%c0_16, %c0_17], %35 {strides = array<i32>} : memref<64x128xf32, #tpu.memory_space<vmem>>, vector<64x128xf32>,
    return
  }
  func.func @transform_0(%arg0: i32) -> (i32, i32) {
    %c0_i32 = arith.constant 0 : i32
    %c0_i32_0 = arith.constant 0 : i32
    return %arg0, %c0_i32 : i32, i32
  }
  func.func @transform_1(%arg0: i32) -> (i32, i32) {
    %c0_i32 = arith.constant 0 : i32
    %c0_i32_0 = arith.constant 0 : i32
    return %arg0, %c0_i32 : i32, i32
  }
  func.func @transform_2(%arg0: i32) -> (i32, i32) {
    %c0_i32 = arith.constant 0 : i32
    %c0_i32_0 = arith.constant 0 : i32
    %c0_i32_1 = arith.constant 0 : i32
    return %c0_i32, %c0_i32_0 : i32, i32
  }
  func.func @transform_3(%arg0: i32) -> (i32, i32) {
    %c0_i32 = arith.constant 0 : i32
    %c0_i32_0 = arith.constant 0 : i32
    %c0_i32_1 = arith.constant 0 : i32
    return %c0_i32, %c0_i32_0 : i32, i32
  }
  func.func @transform_4(%arg0: i32) -> (i32, i32) {
    %c0_i32 = arith.constant 0 : i32
    %c0_i32_0 = arith.constant 0 : i32
    %c0_i32_1 = arith.constant 0 : i32
    return %c0_i32, %c0_i32_0 : i32, i32
  }
  func.func @transform_5(%arg0: i32) -> (i32, i32) {
    %c0_i32 = arith.constant 0 : i32
    %c0_i32_0 = arith.constant 0 : i32
    %c0_i32_1 = arith.constant 0 : i32
    return %c0_i32, %c0_i32_0 : i32, i32
  }
  func.func @transform_6(%arg0: i32) -> (i32, i32) {
    %c0_i32 = arith.constant 0 : i32
    %c0_i32_0 = arith.constant 0 : i32
    return %arg0, %c0_i32 : i32, i32
  }
}

</mosaic_0001>

<bundles_post_ra>
// kernel: gru_cell_forward.1
= control target key start
LH: loop header
LB: loop body
LE: loop exit
PB: predicated region body
PF: predicated region fallthrough
CT: control target
= control target key end

     0   :  { %11 = vsyncpa [#allocation3], 0  ;;  %s2123_s0 = inlined_call_operand.vmem [shape: f32[128,64], index: 0, kind: input, shape index: {}]   ;;  %s2124_s1 = inlined_call_operand.vmem [shape: f32[128,128], index: 1, kind: input, shape index: {}]   ;;  %s2125_s2 = inlined_call_operand.vmem [shape: f32[64,384], index: 2, kind: input, shape index: {}]   ;;  %s2126_s3 = inlined_call_operand.vmem [shape: f32[128,256], index: 3, kind: input, shape index: {}]   ;;  %s2127_s4 = inlined_call_operand.vmem [shape: f32[128,128], index: 4, kind: input, shape index: {}]   ;;  %s2128_s5 = inlined_call_operand.vmem [shape: f32[1,384], index: 5, kind: input, shape index: {}]   ;;  %s2129_s6 = inlined_call_operand.hbm [shape: f32[128,128], index: 6, kind: output, shape index: {}]  }
   0x1   :  { %13 = vsyncpa [#allocation3 + $0x1], 0  ;;  %s1633_s21 = smov 0   ;;  %s1635_s22 = smov 0  }
   0x2   :  { %s1637_s23 = smov 0   ;;  %s1639_s24 = smov 0  }
   0x3 LB: > { %s1654_s25 = sadd.s32 4294967295, %s1592_s24   ;;  %s1105_s26 = sadd.s32 4294967294, %s1592_s24   ;;  %s1592_s24 = sphi %s1639_s24, %s2135_s24   ;;  %s1588_s23 = sphi %s1637_s23, %s2134_s23   ;;  %s1584_s22 = sphi %s1635_s22, %s2133_s22   ;;  %s1580_s21 = sphi %s1633_s21, %s2132_s21  }
   0x4   : > { %s1658_s27 = sadd.s32 1, %s1592_s24   ;;  %s162_s28 = sadd.s32 1, %s1588_s23 }
   0x5   : > { %s159_s29 = ssub.s32 %s1592_s24, %s1658_s27  ;;  %p172_p0 = scmp.ne.s32.totalorder %s1588_s23, %s1584_s22 }
   0x6   : > { %p160_p1 = scmp.eq.s32.totalorder %s159_s29, 0  ;;  %p173_p2 = scmp.eq.s32.totalorder %s1654_s25, 1 }
   0x7   : > { %p178_p3 = scmp.ne.s32.totalorder %s1584_s22, %s1580_s21  ;;  %p179_p4 = scmp.eq.s32.totalorder %s1105_s26, 1 }
   0x8   : > { %s1669_s30 = scalar_select %p160_p1, %s1588_s23, %s162_s28  }
   0x9   : > { %p1671_p5 = por %p173_p2, %p172_p0  ;;  %p1675_p6 = por %p179_p4, %p178_p3 }
   0xa   : > { %p1108_p7 = scmp.ge.s32.totalorder %s1592_s24, 1  ;;  %p227_p8 = scmp.lt.s32.totalorder %s1592_s24, 3 }
   0xc   : > { %p228_p9 = pnand %p1108_p7, %p227_p8 }
   0xd   : > { %v292_v0 = vld [vmem:[%s2125_s2 + $0x8] sm:$0xff] (!%p228_p9)  ;;  %v295_v1 = vld [vmem:[%s2125_s2 + $0x20] sm:$0xff] (!%p228_p9)  ;;  %s1110_s15 = sshll.u32 (!%p228_p9), %s1654_s25, 3  ;;  %v294_v4 = vld [vmem:[%s2125_s2 + $0x18] sm:$0xff] (!%p228_p9)  ;;  %v1594_v7 = vmov (!%p228_p9), 0.0   ;;  %vm332_vm0 = vcmask (!%p228_p9), 523264  }
   0xe   : > { %231 = sbr.rel (%p228_p9) target bundleno = 581 (0x245), region = 44  ;;  %v291_v2 = vld [vmem:[%s2125_s2] sm:$0xff] (!%p228_p9)  ;;  %v1264_v3 = vpack.c.bf16 (!%p228_p9), %v295_v1, %v292_v0  ;;  %v298_v5 = vld [vmem:[%s2125_s2 + $0x38] sm:$0xff] (!%p228_p9)  ;;  %v301_v6 = vld [vmem:[%s2125_s2 + $0x50] sm:$0xff] (!%p228_p9)  ;;  %421 = vmatprep.mubr.f32.mxu0 (!%p228_p9), %v1594_v7  ;;  %p263_p10 = scmp.lt.s32.totalorder (!%p228_p9), %s1110_s15, 15 }
   0xf   : > { %v1266_v8 = vpack.c.bf16 (!%p228_p9), %v294_v4, %v291_v2  ;;  %v1268_v9 = vpack.c.bf16 (!%p228_p9), %v301_v6, %v298_v5  ;;  %v297_v10 = vld [vmem:[%s2125_s2 + $0x30] sm:$0xff] (!%p228_p9)  ;;  %v300_v11 = vld [vmem:[%s2125_s2 + $0x48] sm:$0xff] (!%p228_p9)  ;;  %v307_v13 = vld [vmem:[%s2125_s2 + $0x80] sm:$0xff] (!%p228_p9)  ;;  %s259_s18 = sand.u32 (!%p228_p9), 1, %s1584_s22   ;;  %s1151_s28 = sshll.u32 (!%p228_p9), %s1654_s25, 10 }
  0x10   : > { %v304_v12 = vld [vmem:[%s2125_s2 + $0x68] sm:$0xff] (!%p228_p9)  ;;  %1265 = vmatprep.subr.bf16.mxu0 (!%p228_p9), %v1264_v3  ;;  %v1270_v14 = vpack.c.bf16 (!%p228_p9), %v300_v11, %v297_v10  ;;  %v303_v16 = vld [vmem:[%s2125_s2 + $0x60] sm:$0xff] (!%p228_p9)  ;;  %v306_v17 = vld [vmem:[%s2125_s2 + $0x78] sm:$0xff] (!%p228_p9)  ;;  %s1109_s19 = sshll.u32 (!%p228_p9), %s259_s18, 6  ;;  %s2074_s11 = scalar_lea.hbm (!%p228_p9), %s2129_s6, %s1151_s28 }
  0x11   : > { %1267 = vmatpush1.bf16.msra.mxu0 (!%p228_p9), %v1266_v8  ;;  %v1272_v15 = vpack.c.bf16 (!%p228_p9), %v307_v13, %v304_v12  ;;  %v310_v18 = vld [vmem:[%s2125_s2 + $0x98] sm:$0xff] (!%p228_p9)  ;;  %v313_v19 = vld [vmem:[%s2125_s2 + $0xb0] sm:$0xff] (!%p228_p9)  ;;  %v1274_v21 = vpack.c.bf16 (!%p228_p9), %v306_v17, %v303_v16  ;;  %v312_v24 = vld [vmem:[%s2125_s2 + $0xa8] sm:$0xff] (!%p228_p9)  ;;  %s2052_s26 = scalar_lea.vmem (!%p228_p9), [#allocation2], %s1109_s19  ;;  %s2082_s25 = scalar_lea.sflag (!%p228_p9), [#allocation3], %s259_s18 }
  0x12   : > { %1269 = vmatprep.subr.bf16.mxu0 (!%p228_p9), %v1268_v9  ;;  %v1276_v22 = vpack.c.bf16 (!%p228_p9), %v313_v19, %v310_v18  ;;  %v309_v23 = vld [vmem:[%s2125_s2 + $0x90] sm:$0xff] (!%p228_p9)  ;;  %v576_v25 = vld [vmem:[%s2126_s3 + $0x8] sm:$0xff] (!%p228_p9)  ;;  %v578_v26 = vld [vmem:[%s2126_s3 + $0x18] sm:$0xff] (!%p228_p9)  ;;  %s1031_s29 = sshll.u32 (!%p228_p9), %s2052_s26, 4  ;;  %s1595_s14 = smov (!%p228_p9), [#allocation2]   ;;  %s2076_s29 = int_to_ptr.vmem [resolvable:$true] %s1031_s29 }
  0x13   : > { %v1278_v27 = vpack.c.bf16 (!%p228_p9), %v312_v24, %v309_v23  ;;  %v1296_v28 = vpack.c.bf16 (!%p228_p9), %v578_v26, %v576_v25  ;;  %v575_v29 = vld [vmem:[%s2126_s3] sm:$0xff] (!%p228_p9)  ;;  %v577_v30 = vld [vmem:[%s2126_s3 + $0x10] sm:$0xff] (!%p228_p9)  ;;  %v580_v31 = vld [vmem:[%s2126_s3 + $0x28] sm:$0xff] (!%p228_p9)  ;;  %s1530_s13 = scalar_lea.vmem (!%p228_p9), %s2076_s29, 1024 }
  0x14   : > { %v582_v32 = vld [vmem:[%s2126_s3 + $0x38] sm:$0xff] (!%p228_p9)  ;;  %v1298_v33 = vpack.c.bf16 (!%p228_p9), %v577_v30, %v575_v29  ;;  %v579_v35 = vld [vmem:[%s2126_s3 + $0x20] sm:$0xff] (!%p228_p9)  ;;  %v581_v36 = vld [vmem:[%s2126_s3 + $0x30] sm:$0xff] (!%p228_p9)  ;;  %p1531_p11 = scmp.ne.s32.totalorder (!%p228_p9), %s2076_s29, %s1530_s13 }
  0x15   : > { %s2137_s15 = smov (!%p263_p10, %s1110_s15), 15  ;;  %1271 = vmatpush1.bf16.msra.mxu0 %v1270_v14  ;;  %v1300_v34 = vpack.c.bf16 %v582_v32, %v580_v31  ;;  %v584_v37 = vld [vmem:[%s2126_s3 + $0x48] sm:$0xff]  ;;  %v586_v38 = vld [vmem:[%s2126_s3 + $0x58] sm:$0xff]  ;;  %v1302_v40 = vpack.c.bf16 %v581_v36, %v579_v35  ;;  %v583_v41 = vld [vmem:[%s2126_s3 + $0x40] sm:$0xff] }
  0x16   : > { %s1111_s20 = sshll.u32 %s2137_s15, 3  ;;  %1273 = vmatprep.subr.bf16.mxu0 %v1272_v15  ;;  %v585_v42 = vld [vmem:[%s2126_s3 + $0x50] sm:$0xff]  ;;  %v1304_v43 = vpack.c.bf16 %v586_v38, %v584_v37  ;;  %v588_v44 = vld [vmem:[%s2126_s3 + $0x68] sm:$0xff]  ;;  %v590_v47 = vld [vmem:[%s2126_s3 + $0x78] sm:$0xff]  ;;  %p1532_p12 = pnand %p1531_p11, %p1671_p5 }
  0x17   : > { %s1733_s12 = scalar_lea.vmem %s2123_s0, %s1111_s20  ;;  %v293_v45 = vld [vmem:[%s2125_s2 + $0x10] sm:$0xff]  ;;  %v296_v46 = vld [vmem:[%s2125_s2 + $0x28] sm:$0xff]  ;;  %v299_v49 = vld [vmem:[%s2125_s2 + $0x40] sm:$0xff]  ;;  %v1306_v53 = vpack.c.bf16 %v585_v42, %v583_v41  ;;  %v1308_v56 = vpack.c.bf16 %v590_v47, %v588_v44  ;;  %s1899_s16 = scalar_lea.vmem %s2124_s1, %s1111_s20 }
  0x18   : > { %v275_v20 = vld [vmem:[%s1733_s12] sm:$0xff]  ;;  %v1776_v39 = vld [vmem:[%s1733_s12 + $0x8] sm:$0xff]  ;;  %v1280_v48 = vpack.c.bf16 %v296_v46, %v293_v45  ;;  %v302_v50 = vld [vmem:[%s2125_s2 + $0x58] sm:$0xff]  ;;  %p1533_p13 = pneg %p1532_p12 }
  0x19   : > { %1208 = vmatprep.mubr.msk.f32.mxu1 %vm332_vm0, %v275_v20  ;;  %1275 = vmatpush1.bf16.msra.mxu0 %v1274_v21  ;;  %v1284_v51 = vpack.c.bf16 %v302_v50, %v299_v49  ;;  %v1806_v52 = vld [vmem:[%s1733_s12 + $0x10] sm:$0xff]  ;;  %v308_v55 = vld [vmem:[%s2125_s2 + $0x88] sm:$0xff]  ;;  %v587_v57 = vld [vmem:[%s2126_s3 + $0x60] sm:$0xff] }
  0x1a   : > { %1277 = vmatprep.subr.bf16.mxu0 %v1276_v22  ;;  %v305_v54 = vld [vmem:[%s2125_s2 + $0x70] sm:$0xff]  ;;  %1281 = vmatprep.subr.bf16.mxu1 %v1280_v48  ;;  %v592_v59 = vld [vmem:[%s2126_s3 + $0x88] sm:$0xff]  ;;  %v594_v60 = vld [vmem:[%s2126_s3 + $0x98] sm:$0xff] }
  0x1b   : > { %v589_v58 = vld [vmem:[%s2126_s3 + $0x70] sm:$0xff]  ;;  %1283 = vmatpush3.bf16.msra.mxu1 %v1280_v48  ;;  %v1288_v61 = vpack.c.bf16 %v308_v55, %v305_v54  ;;  %v278_v62 = vld [vmem:[%s1733_s12 + $0x18] sm:$0xff]  ;;  %v311_v0 = vld [vmem:[%s2125_s2 + $0xa0] sm:$0xff]  ;;  %v1312_v2 = vpack.c.bf16 %v594_v60, %v592_v59 }
  0x1c   : > { %1285 = vmatprep.subr.bf16.mxu1 %v1284_v51  ;;  %v1310_v63 = vpack.c.bf16 %v589_v58, %v587_v57  ;;  %v314_v1 = vld [vmem:[%s2125_s2 + $0xb8] sm:$0xff]  ;;  %v591_v3 = vld [vmem:[%s2126_s3 + $0x80] sm:$0xff]  ;;  %v593_v4 = vld [vmem:[%s2126_s3 + $0x90] sm:$0xff] }
  0x1d   : > { %1279 = vmatpush1.bf16.msra.mxu0 %v1278_v27  ;;  %v596_v5 = vld [vmem:[%s2126_s3 + $0xa8] sm:$0xff]  ;;  %v598_v6 = vld [vmem:[%s2126_s3 + $0xb8] sm:$0xff]  ;;  %v1292_v8 = vpack.c.bf16 %v314_v1, %v311_v0  ;;  %v279_v9 = vld [vmem:[%s1733_s12 + $0x20] sm:$0xff]  ;;  %v1314_v10 = vpack.c.bf16 %v593_v4, %v591_v3 }
  0x1e   : > { %1297 = vmatprep.subr.bf16.mxu0 %v1296_v28  ;;  %v1316_v11 = vpack.c.bf16 %v598_v6, %v596_v5  ;;  %v595_v12 = vld [vmem:[%s2126_s3 + $0xa0] sm:$0xff]  ;;  %v597_v13 = vld [vmem:[%s2126_s3 + $0xb0] sm:$0xff]  ;;  %v600_v14 = vld [vmem:[%s2126_s3 + $0xc8] sm:$0xff] }
  0x1f   : > { %1287 = vmatpush3.bf16.msra.mxu1 %v1284_v51  ;;  %v602_v15 = vld [vmem:[%s2126_s3 + $0xd8] sm:$0xff]  ;;  %v280_v16 = vld [vmem:[%s1733_s12 + $0x28] sm:$0xff]  ;;  %v1318_v17 = vpack.c.bf16 %v597_v13, %v595_v12  ;;  %v599_v19 = vld [vmem:[%s2126_s3 + $0xc0] sm:$0xff] }
  0x20   : > { %1114 = vmatmul.mubr.msk.f32.vlgmr.msra.gmra.mrb[0].mxu0 %vm332_vm0, %v275_v20  ;;  %1289 = vmatprep.subr.bf16.mxu1 %v1288_v61  ;;  %v1320_v18 = vpack.c.bf16 %v602_v15, %v600_v14  ;;  %v601_v20 = vld [vmem:[%s2126_s3 + $0xd0] sm:$0xff]  ;;  %v604_v21 = vld [vmem:[%s2126_s3 + $0xe8] sm:$0xff]  ;;  %v606_v22 = vld [vmem:[%s2126_s3 + $0xf8] sm:$0xff] }
  0x21   : > { %1299 = vmatpush1.bf16.msra.mxu0 %v1298_v33  ;;  %427 = vmatprep.mubr.f32.mxu0 %v1594_v7  ;;  %v281_v23 = vld [vmem:[%s1733_s12 + $0x30] sm:$0xff]  ;;  %v1322_v24 = vpack.c.bf16 %v601_v20, %v599_v19  ;;  %v1324_v25 = vpack.c.bf16 %v606_v22, %v604_v21  ;;  %v603_v26 = vld [vmem:[%s2126_s3 + $0xe0] sm:$0xff]  ;;  %v282_v28 = vld [vmem:[%s1733_s12 + $0x38] sm:$0xff] }
  0x22   : > { %1301 = vmatprep.subr.bf16.mxu0 %v1300_v34  ;;  %v605_v27 = vld [vmem:[%s2126_s3 + $0xf0] sm:$0xff]  ;;  %v1906_v30 = vld [vmem:[%s1899_s16] sm:$0xff]  ;;  %v1913_v31 = vld [vmem:[%s1899_s16 + $0x8] sm:$0xff] }
  0x23   : > { %1291 = vmatpush3.bf16.msra.mxu1 %v1288_v61  ;;  %v1326_v29 = vpack.c.bf16 %v605_v27, %v603_v26  ;;  %v1919_v32 = vld [vmem:[%s1899_s16 + $0x10] sm:$0xff]  ;;  %v1924_v33 = vld [vmem:[%s1899_s16 + $0x18] sm:$0xff]  ;;  %v1929_v34 = vld [vmem:[%s1899_s16 + $0x20] sm:$0xff]  ;;  %v317_v61 = vlaneseq }
  0x24   : > { %1115 = vmatmul.mubr.msk.f32.gmra.mrb[2].mxu0 %vm332_vm0, %v1776_v39  ;;  %1293 = vmatprep.subr.bf16.mxu1 %v1292_v8  ;;  %v1934_v35 = vld [vmem:[%s1899_s16 + $0x28] sm:$0xff]  ;;  %v1939_v36 = vld [vmem:[%s1899_s16 + $0x30] sm:$0xff]  ;;  %v1944_v37 = vld [vmem:[%s1899_s16 + $0x38] sm:$0xff]  ;;  %s1534_s16 = sshll.u32 %s1595_s14, 4  ;;  %s1535_s16 = int_to_ptr.vmem [resolvable:$false] %s1534_s16 }
  0x25   : > { %1303 = vmatpush1.bf16.msra.mxu0 %v1302_v40  ;;  %433 = vmatprep.mubr.f32.mxu0 %v1594_v7  ;;  %v840_v38 = vld [vmem:[%s2127_s4] sm:$0xff]  ;;  %v842_v41 = vld [vmem:[%s2127_s4 + $0x10] sm:$0xff]  ;;  %v845_v44 = vld [vmem:[%s2127_s4 + $0x28] sm:$0xff]  ;;  %s1536_s15 = scalar_lea.vmem %s1535_s16, 2048  ;;  %p1537_p0 = scmp.lt.s32.totalorder %s2076_s29, %s1535_s16 }
  0x26   : > { %1305 = vmatprep.subr.bf16.mxu0 %v1304_v43  ;;  %v844_v43 = vld [vmem:[%s2127_s4 + $0x20] sm:$0xff]  ;;  %v846_v46 = vld [vmem:[%s2127_s4 + $0x30] sm:$0xff]  ;;  %v847_v47 = vld [vmem:[%s2127_s4 + $0x38] sm:$0xff]  ;;  %p1538_p1 = scmp.lt.s32.totalorder %s1536_s15, %s1530_s13 }
  0x27   : > { %1295 = vmatpush3.bf16.msra.mxu1 %v1292_v8  ;;  %v1336_v45 = vpack.c.bf16 %v845_v44, %v844_v43  ;;  %v1340_v48 = vpack.c.bf16 %v847_v47, %v846_v46  ;;  %v848_v49 = vld [vmem:[%s2127_s4 + $0x40] sm:$0xff]  ;;  %v849_v50 = vld [vmem:[%s2127_s4 + $0x48] sm:$0xff]  ;;  %v854_v58 = vld [vmem:[%s2127_s4 + $0x70] sm:$0xff] }
  0x28   : > { %1116 = vmatmul.mubr.msk.f32.gmra.mrb[4].mxu0 %vm332_vm0, %v1806_v52  ;;  %v1344_v51 = vpack.c.bf16 %v849_v50, %v848_v49  ;;  %v852_v55 = vld [vmem:[%s2127_s4 + $0x60] sm:$0xff]  ;;  %v855_v59 = vld [vmem:[%s2127_s4 + $0x78] sm:$0xff]  ;;  %p1539_p2 = por %p1538_p1, %p1537_p0 }
  0x29   : > { %1307 = vmatpush1.bf16.msra.mxu0 %v1306_v53  ;;  %439 = vmatprep.mubr.f32.mxu0 %v1594_v7  ;;  %v851_v53 = vld [vmem:[%s2127_s4 + $0x58] sm:$0xff]  ;;  %v1356_v60 = vpack.c.bf16 %v855_v59, %v854_v58  ;;  %v2001_v0 = vld [vmem:[%s2128_s5] sm:$0x7] }
  0x2a   : > { %1309 = vmatprep.subr.bf16.mxu0 %v1308_v56  ;;  %1209 = vmatmul.mubr.msk.f32.vlgmr.msra.gmra.mrb[0].mxu1 %vm332_vm0, %v1776_v39  ;;  %v841_v39 = vld [vmem:[%s2127_s4 + $0x8] sm:$0xff]  ;;  %p1540_p3 = pnand %p1539_p2, %p1533_p13 }
  0x2b   : > { %1211 = vmatprep.mubr.msk.f32.mxu1 %vm332_vm0, %v1806_v52  ;;  %v1328_v40 = vpack.c.bf16 %v841_v39, %v840_v38  ;;  %v850_v52 = vld [vmem:[%s2127_s4 + $0x50] sm:$0xff]  ;;  %v853_v56 = vld [vmem:[%s2127_s4 + $0x68] sm:$0xff] }
  0x2c   : > { %1117 = vmatmul.mubr.msk.f32.gmra.mrb[6].mxu0 %vm332_vm0, %v278_v62  ;;  %v1348_v54 = vpack.c.bf16 %v851_v53, %v850_v52  ;;  %v1352_v57 = vpack.c.bf16 %v853_v56, %v852_v55 }
  0x2d   : > { %1311 = vmatpush1.bf16.msra.mxu0 %v1310_v63  ;;  %445 = vmatprep.mubr.f32.mxu0 %v1594_v7 }
  0x2e   : > { %1313 = vmatprep.subr.bf16.mxu0 %v1312_v2  ;;  %1212 = vmatmul.mubr.msk.f32.gmra.mrb[2].mxu1 %vm332_vm0, %v278_v62  ;;  %v1995_v62 = vshrl.u32 %v317_v61, 7 }
  0x2f   : > { %1214 = vmatprep.mubr.msk.f32.mxu1 %vm332_vm0, %v279_v9  ;;  %1329 = vmatprep.subr.bf16.mxu1 %v1328_v40 }
  0x30   : > { %1118 = vmatmul.mubr.msk.f32.gmra.mrb[8].mxu0 %vm332_vm0, %v279_v9  ;;  %1331 = vmatpush3.bf16.msra.mxu1 %v1328_v40  ;;  %v319_v63 = vsub.s32 0, %v1995_v62 }
  0x31   : > { %1315 = vmatpush1.bf16.msra.mxu0 %v1314_v10  ;;  %451 = vmatprep.mubr.f32.mxu0 %v1594_v7 }
  0x32   : > { %1317 = vmatprep.subr.bf16.mxu0 %v1316_v11  ;;  %1215 = vmatmul.mubr.msk.f32.gmra.mrb[4].mxu1 %vm332_vm0, %v280_v16  ;;  %v320_v1 = vrot.slane %v2001_v0, %v319_v63 }
  0x33   : > { %1217 = vmatprep.mubr.msk.f32.mxu1 %vm332_vm0, %v281_v23 }
  0x34   : > { %1119 = vmatmul.mubr.msk.f32.gmra.mrb[10].mxu0 %vm332_vm0, %v280_v16 }
  0x35   : > { %1319 = vmatpush1.bf16.msra.mxu0 %v1318_v17  ;;  %457 = vmatprep.mubr.f32.mxu0 %v1594_v7 }
  0x36   : > { %1321 = vmatprep.subr.bf16.mxu0 %v1320_v18  ;;  %1218 = vmatmul.mubr.msk.f32.gmra.mrb[6].mxu1 %vm332_vm0, %v282_v28 }
  0x38   : > { %1120 = vmatmul.mubr.msk.f32.gmra.mrb[12].mxu0 %vm332_vm0, %v281_v23 }
  0x39   : > { %1323 = vmatpush1.bf16.msra.mxu0 %v1322_v24  ;;  %463 = vmatprep.mubr.f32.mxu0 %v1594_v7 }
  0x3a   : > { %1325 = vmatprep.subr.bf16.mxu0 %v1324_v25 }
  0x3c   : > { %1121 = vmatmul.mubr.msk.f32.gmra.mrb[14].mxu0 %vm332_vm0, %v282_v28 }
  0x3d   : > { %1327 = vmatpush1.bf16.msra.mxu0 %v1326_v29  ;;  %671 = vmatprep.mubr.f32.mxu0 %v1594_v7 }
  0x40   : > { %672 = vmatmul.mubr.f32.vlgmr.msra.gmra.mrb[0].mxu0 %v1906_v30 }
  0x41   : > { %677 = vmatprep.mubr.f32.mxu0 %v1594_v7 }
  0x44   : > { %678 = vmatmul.mubr.f32.gmra.mrb[2].mxu0 %v1913_v31 }
  0x45   : > { %683 = vmatprep.mubr.f32.mxu0 %v1594_v7 }
  0x48   : > { %684 = vmatmul.mubr.f32.gmra.mrb[4].mxu0 %v1919_v32 }
  0x49   : > { %689 = vmatprep.mubr.f32.mxu0 %v1594_v7 }
  0x4c   : > { %690 = vmatmul.mubr.f32.gmra.mrb[6].mxu0 %v1924_v33 }
  0x4d   : > { %695 = vmatprep.mubr.f32.mxu0 %v1594_v7 }
  0x50   : > { %696 = vmatmul.mubr.f32.gmra.mrb[8].mxu0 %v1929_v34 }
  0x51   : > { %701 = vmatprep.mubr.f32.mxu0 %v1594_v7 }
  0x54   : > { %702 = vmatmul.mubr.f32.gmra.mrb[10].mxu0 %v1934_v35 }
  0x55   : > { %707 = vmatprep.mubr.f32.mxu0 %v1594_v7 }
  0x58   : > { %708 = vmatmul.mubr.f32.gmra.mrb[12].mxu0 %v1939_v36 }
  0x59   : > { %713 = vmatprep.mubr.f32.mxu0 %v1594_v7  ;;  %v843_v7 = vld [vmem:[%s2127_s4 + $0x18] sm:$0xff] }
  0x5a   : > { %v1332_v42 = vpack.c.bf16 %v843_v7, %v842_v41 }
  0x5c   : > { %714 = vmatmul.mubr.f32.gmra.mrb[14].mxu0 %v1944_v37  ;;  %1333 = vmatprep.subr.bf16.mxu1 %v1332_v42 }
  0x5d   : > { %1335 = vmatpush3.bf16.msra.mxu1 %v1332_v42 }
  0x5e   : > { %1337 = vmatprep.subr.bf16.mxu1 %v1336_v45 }
  0x61   : > { %1339 = vmatpush3.bf16.msra.mxu1 %v1336_v45 }
  0x62   : > { %1341 = vmatprep.subr.bf16.mxu1 %v1340_v48 }
  0x65   : > { %1343 = vmatpush3.bf16.msra.mxu1 %v1340_v48 }
  0x66   : > { %1345 = vmatprep.subr.bf16.mxu1 %v1344_v51 }
  0x69   : > { %1347 = vmatpush3.bf16.msra.mxu1 %v1344_v51 }
  0x6a   : > { %1349 = vmatprep.subr.bf16.mxu1 %v1348_v54 }
  0x6d   : > { %1351 = vmatpush3.bf16.msra.mxu1 %v1348_v54 }
  0x6e   : > { %1353 = vmatprep.subr.bf16.mxu1 %v1352_v57 }
  0x71   : > { %1355 = vmatpush3.bf16.msra.mxu1 %v1352_v57 }
  0x72   : > { %1357 = vmatprep.subr.bf16.mxu1 %v1356_v60 }
  0x75   : > { %1359 = vmatpush3.bf16.msra.mxu1 %v1356_v60 }
 0x113   : > { %v673_v2 = vpop.f32.mrb[0].mxu0 }
 0x114   : > { %v1360_v3 = vadd.f32 %v673_v2, %v320_v1  ;;  %v2004_v4 = vpop.f32.mrb[1].mxu0 }
 0x116   : > { %v1130_v5 = vmul.f32 -1.442695, %v1360_v3 }
 0x117   : > { %v679_v6 = vpop.f32.mrb[2].mxu0 }
 0x118   : > { %1450 = vpow2.f32 %v1130_v5  ;;  %v1362_v8 = vadd.f32 %v679_v6, %v320_v1  ;;  %v2006_v9 = vpop.f32.mrb[3].mxu0 }
 0x11a   : > { %v1131_v10 = vmul.f32 -1.442695, %v1362_v8 }
 0x11b   : > { %v685_v11 = vpop.f32.mrb[4].mxu0 }
 0x11c   : > { %1452 = vpow2.f32 %v1131_v10  ;;  %v1364_v12 = vadd.f32 %v685_v11, %v320_v1  ;;  %v2008_v13 = vpop.f32.mrb[5].mxu0 }
 0x11e   : > { %v1132_v14 = vmul.f32 -1.442695, %v1364_v12 }
 0x11f   : > { %v691_v15 = vpop.f32.mrb[6].mxu0 }
 0x120   : > { %1454 = vpow2.f32 %v1132_v14  ;;  %v1366_v16 = vadd.f32 %v691_v15, %v320_v1  ;;  %v2010_v17 = vpop.f32.mrb[7].mxu0 }
 0x122   : > { %v1451_v18 = vpop.eup %1450  ;;  %v1133_v19 = vmul.f32 -1.442695, %v1366_v16  ;;  %v323_v16 = vsub.s32 1, %v1995_v62 }
 0x123   : > { %v752_v20 = vadd.f32 1.0, %v1451_v18  ;;  %v697_v21 = vpop.f32.mrb[8].mxu0 }
 0x124   : > { %1456 = vpow2.f32 %v1133_v19  ;;  %v1368_v22 = vadd.f32 %v697_v21, %v320_v1  ;;  %v2012_v23 = vpop.f32.mrb[9].mxu0  ;;  %v324_v18 = vrot.slane %v2001_v0, %v323_v16 }
 0x125   : > { %1458 = vrcp.f32 %v752_v20 }
 0x126   : > { %v1453_v24 = vpop.eup %1452  ;;  %v1134_v25 = vmul.f32 -1.442695, %v1368_v22  ;;  %v1363_v19 = vadd.f32 %v2006_v9, %v324_v18  ;;  %v1361_v20 = vadd.f32 %v2004_v4, %v324_v18  ;;  %v327_v4 = vsub.s32 2, %v1995_v62 }
 0x127   : > { %v753_v26 = vadd.f32 1.0, %v1453_v24  ;;  %v703_v27 = vpop.f32.mrb[10].mxu0  ;;  %v1365_v24 = vadd.f32 %v2008_v13, %v324_v18 }
 0x128   : > { %1460 = vpow2.f32 %v1134_v25  ;;  %v1370_v28 = vadd.f32 %v703_v27, %v320_v1  ;;  %v2014_v29 = vpop.f32.mrb[11].mxu0  ;;  %v1139_v21 = vmul.f32 -1.442695, %v1363_v19  ;;  %v1138_v22 = vmul.f32 -1.442695, %v1361_v20 }
 0x129   : > { %1462 = vrcp.f32 %v753_v26  ;;  %v1367_v25 = vadd.f32 %v2010_v17, %v324_v18  ;;  %v1140_v26 = vmul.f32 -1.442695, %v1365_v24  ;;  %v2038_v13 = vrot.slane %v2001_v0, %v327_v4 }
 0x12a   : > { %v1455_v38 = vpop.eup %1454  ;;  %v1135_v39 = vmul.f32 -1.442695, %v1370_v28 }
 0x12b   : > { %v754_v40 = vadd.f32 1.0, %v1455_v38  ;;  %v709_v41 = vpop.f32.mrb[12].mxu0  ;;  %v1141_v27 = vmul.f32 -1.442695, %v1367_v25  ;;  %v1371_v38 = vadd.f32 %v2014_v29, %v324_v18 }
 0x12c   : > { %1464 = vpow2.f32 %v1135_v39  ;;  %v1372_v7 = vadd.f32 %v709_v41, %v320_v1  ;;  %v2016_v42 = vpop.f32.mrb[13].mxu0  ;;  %v1369_v39 = vadd.f32 %v2012_v23, %v324_v18 }
 0x12d   : > { %1466 = vrcp.f32 %v754_v40  ;;  %v1143_v41 = vmul.f32 -1.442695, %v1371_v38  ;;  %v1373_v23 = vadd.f32 %v2016_v42, %v324_v18 }
 0x12e   : > { %v1457_v43 = vpop.eup %1456  ;;  %v1136_v44 = vmul.f32 -1.442695, %v1372_v7  ;;  %v1142_v7 = vmul.f32 -1.442695, %v1369_v39 }
 0x12f   : > { %v1459_v45 = vpop.eup %1458  ;;  %v755_v46 = vadd.f32 1.0, %v1457_v43  ;;  %v715_v47 = vpop.f32.mrb[14].mxu0 }
 0x130   : > { %1468 = vpow2.f32 %v1136_v44  ;;  %v1374_v48 = vadd.f32 %v715_v47, %v320_v1  ;;  %v2018_v49 = vpop.f32.mrb[15].mxu0  ;;  %v832_v50 = vmul.f32 %v1459_v45, %v1906_v30 }
 0x131   : > { %1470 = vrcp.f32 %v755_v46  ;;  %v1375_v29 = vadd.f32 %v2018_v49, %v324_v18 }
 0x132   : > { %v1461_v51 = vpop.eup %1460  ;;  %v1137_v52 = vmul.f32 -1.442695, %v1374_v48  ;;  %1252 = vmatprep.mubr.f32.mxu1 %v832_v50 }
 0x133   : > { %v1463_v53 = vpop.eup %1462  ;;  %v756_v54 = vadd.f32 1.0, %v1461_v51  ;;  %v1145_v0 = vmul.f32 -1.442695, %v1375_v29  ;;  %v1144_v51 = vmul.f32 -1.442695, %v1373_v23 }
 0x134   : > { %v833_v55 = vmul.f32 %v1463_v53, %v1913_v31 }
 0x135   : > { %1472 = vrcp.f32 %v756_v54 }
 0x136   : > { %v1465_v56 = vpop.eup %1464  ;;  %1474 = vpow2.f32 %v1137_v52  ;;  %1253 = vmatmul.mubr.f32.vlgmr.msra.gmra.mrb[0].mxu1 %v833_v55 }
 0x137   : > { %v1467_v57 = vpop.eup %1466  ;;  %v757_v58 = vadd.f32 1.0, %v1465_v56 }
 0x138   : > { %v834_v59 = vmul.f32 %v1467_v57, %v1919_v32 }
 0x139   : > { %1476 = vrcp.f32 %v757_v58 }
 0x13a   : > { %v1469_v60 = vpop.eup %1468  ;;  %1255 = vmatprep.mubr.f32.mxu1 %v834_v59 }
 0x13b   : > { %v1471_v61 = vpop.eup %1470  ;;  %v758_v63 = vadd.f32 1.0, %v1469_v60 }
 0x13c   : > { %v835_v1 = vmul.f32 %v1471_v61, %v1924_v33 }
 0x13d   : > { %1478 = vrcp.f32 %v758_v63 }
 0x13e   : > { %1256 = vmatmul.mubr.f32.gmra.mrb[2].mxu1 %v835_v1 }
 0x13f   : > { %v1473_v2 = vpop.eup %1472 }
 0x140   : > { %v1475_v3 = vpop.eup %1474  ;;  %v836_v5 = vmul.f32 %v1473_v2, %v1929_v34 }
 0x141   : > { %v759_v6 = vadd.f32 1.0, %v1475_v3 }
 0x142   : > { %1258 = vmatprep.mubr.f32.mxu1 %v836_v5 }
 0x143   : > { %v1477_v8 = vpop.eup %1476  ;;  %1480 = vrcp.f32 %v759_v6 }
 0x144   : > { %v837_v10 = vmul.f32 %v1477_v8, %v1934_v35  ;;  %1482 = vpow2.f32 %v1139_v21 }
 0x145   : > { %1484 = vpow2.f32 %v1138_v22 }
 0x146   : > { %1259 = vmatmul.mubr.f32.gmra.mrb[4].mxu1 %v837_v10  ;;  %1486 = vpow2.f32 %v1140_v26 }
 0x147   : > { %v1479_v11 = vpop.eup %1478  ;;  %1488 = vpow2.f32 %v1141_v27 }
 0x148   : > { %v838_v12 = vmul.f32 %v1479_v11, %v1939_v36 }
 0x14a   : > { %1261 = vmatprep.mubr.f32.mxu1 %v838_v12 }
 0x14d   : > { %v1481_v14 = vpop.eup %1480 }
 0x14e   : > { %v839_v15 = vmul.f32 %v1481_v14, %v1944_v37  ;;  %v1483_v28 = vpop.eup %1482 }
 0x14f   : > { %v1485_v9 = vpop.eup %1484  ;;  %v809_v40 = vadd.f32 1.0, %v1483_v28 }
 0x150   : > { %1262 = vmatmul.mubr.f32.gmra.mrb[6].mxu1 %v839_v15  ;;  %v808_v43 = vadd.f32 1.0, %v1485_v9  ;;  %v1487_v17 = vpop.eup %1486 }
 0x151   : > { %1490 = vrcp.f32 %v809_v40  ;;  %v1489_v44 = vpop.eup %1488  ;;  %v810_v47 = vadd.f32 1.0, %v1487_v17 }
 0x152   : > { %1492 = vpow2.f32 %v1143_v41  ;;  %v811_v50 = vadd.f32 1.0, %v1489_v44 }
 0x153   : > { %1494 = vpow2.f32 %v1142_v7 }
 0x154   : > { %1496 = vrcp.f32 %v808_v43 }
 0x15b   : > { %v1491_v52 = vpop.eup %1490 }
 0x15c   : > { %v1493_v49 = vpop.eup %1492  ;;  %v978_v60 = vsub.f32 1.0, %v1491_v52  ;;  %v994_v2 = vmul.f32 %v1491_v52, %v1913_v31 }
 0x15d   : > { %v1495_v42 = vpop.eup %1494  ;;  %v813_v58 = vadd.f32 1.0, %v1493_v49 }
 0x15e   : > { %v1497_v56 = vpop.eup %1496  ;;  %v812_v59 = vadd.f32 1.0, %v1495_v42 }
 0x15f   : > { %v977_v63 = vsub.f32 1.0, %v1497_v56  ;;  %v993_v5 = vmul.f32 %v1497_v56, %v1906_v30 }
 0x209   : > { %v1254_v45 = vpop.f32.mrb[0].mxu1 }
 0x20a   : > { %v1376_v46 = vadd.f32 %v1254_v45, %v2038_v13  ;;  %v922_v62 = vpop.f32.mrb[1].mxu1 }
 0x20b   : > { %v1377_v48 = vadd.f32 %v922_v62, %v2038_v13 }
 0x20c   : > { %1498 = vtanh.f32 %v1376_v46 }
 0x20d   : > { %1500 = vtanh.f32 %v1377_v48 }
 0x20e   : > { %1502 = vrcp.f32 %v810_v47 }
 0x20f   : > { %1504 = vrcp.f32 %v811_v50 }
 0x210   : > { %1506 = vpow2.f32 %v1145_v0 }
 0x211   : > { %v1257_v53 = vpop.f32.mrb[2].mxu1  ;;  %1508 = vpow2.f32 %v1144_v51 }
 0x212   : > { %v1378_v54 = vadd.f32 %v1257_v53, %v2038_v13  ;;  %v932_v55 = vpop.f32.mrb[3].mxu1 }
 0x213   : > { %v1379_v57 = vadd.f32 %v932_v55, %v2038_v13 }
 0x214   : > { %1510 = vtanh.f32 %v1378_v54 }
 0x215   : > { %1512 = vtanh.f32 %v1379_v57 }
 0x216   : > { %v1499_v61 = vpop.eup %1498  ;;  %1514 = vrcp.f32 %v813_v58 }
 0x217   : > { %v1501_v1 = vpop.eup %1500  ;;  %v986_v3 = vmul.f32 %v1499_v61, %v978_v60  ;;  %1516 = vrcp.f32 %v812_v59 }
 0x218   : > { %v985_v6 = vmul.f32 %v1501_v1, %v977_v63  ;;  %v1503_v8 = vpop.eup %1502 }
 0x219   : > { %v1002_v10 = vadd.f32 %v994_v2, %v986_v3  ;;  %v1260_v11 = vpop.f32.mrb[4].mxu1  ;;  %v1505_v12 = vpop.eup %1504  ;;  %v979_v22 = vsub.f32 1.0, %v1503_v8  ;;  %v995_v28 = vmul.f32 %v1503_v8, %v1919_v32 }
 0x21a   : > { %v1001_v14 = vadd.f32 %v993_v5, %v985_v6  ;;  %v1380_v15 = vadd.f32 %v1260_v11, %v2038_v13  ;;  %v942_v16 = vpop.f32.mrb[5].mxu1  ;;  %v1507_v18 = vpop.eup %1506  ;;  %v980_v19 = vsub.f32 1.0, %v1505_v12  ;;  %v996_v25 = vmul.f32 %v1505_v12, %v1924_v33 }
 0x21b   : > { %1010 = vst [vmem:[%s2052_s26 + $0x8] sm:$0xff] %v1002_v10  ;;  %v1381_v31 = vadd.f32 %v942_v16, %v2038_v13  ;;  %v1509_v30 = vpop.eup %1508  ;;  %v815_v21 = vadd.f32 1.0, %v1507_v18 }
 0x21c   : > { %1009 = vst [vmem:[%s2052_s26] sm:$0xff] %v1001_v14  ;;  %1518 = vtanh.f32 %v1380_v15  ;;  %v814_v26 = vadd.f32 1.0, %v1509_v30 }
 0x21d   : > { %1520 = vtanh.f32 %v1381_v31 }
 0x21e   : > { %v1511_v20 = vpop.eup %1510  ;;  %1522 = vrcp.f32 %v815_v21 }
 0x21f   : > { %v1513_v24 = vpop.eup %1512  ;;  %v988_v27 = vmul.f32 %v1511_v20, %v980_v19  ;;  %1524 = vrcp.f32 %v814_v26 }
 0x220   : > { %v987_v38 = vmul.f32 %v1513_v24, %v979_v22  ;;  %v1515_v9 = vpop.eup %1514 }
 0x221   : > { %v1004_v39 = vadd.f32 %v996_v25, %v988_v27  ;;  %v1517_v4 = vpop.eup %1516  ;;  %v982_v33 = vsub.f32 1.0, %v1515_v9  ;;  %v998_v45 = vmul.f32 %v1515_v9, %v1934_v35 }
 0x222   : > { %v1003_v40 = vadd.f32 %v995_v28, %v987_v38  ;;  %v981_v32 = vsub.f32 1.0, %v1517_v4  ;;  %v997_v46 = vmul.f32 %v1517_v4, %v1929_v34 }
 0x223   : > { %1012 = vst [vmem:[%s2052_s26 + $0x18] sm:$0xff] %v1004_v39  ;;  %v1263_v41 = vpop.f32.mrb[6].mxu1 }
 0x224   : > { %1011 = vst [vmem:[%s2052_s26 + $0x10] sm:$0xff] %v1003_v40  ;;  %v1382_v7 = vadd.f32 %v1263_v41, %v2038_v13  ;;  %v952_v43 = vpop.f32.mrb[7].mxu1 }
 0x225   : > { %v1383_v17 = vadd.f32 %v952_v43, %v2038_v13 }
 0x226   : > { %v1519_v44 = vpop.eup %1518  ;;  %1526 = vtanh.f32 %v1382_v7 }
 0x227   : > { %v1521_v29 = vpop.eup %1520  ;;  %v990_v23 = vmul.f32 %v1519_v44, %v982_v33  ;;  %1528 = vtanh.f32 %v1383_v17 }
 0x228   : > { %v989_v62 = vmul.f32 %v1521_v29, %v981_v32  ;;  %v1523_v50 = vpop.eup %1522 }
 0x229   : > { %v1006_v47 = vadd.f32 %v998_v45, %v990_v23  ;;  %v1525_v13 = vpop.eup %1524  ;;  %v984_v0 = vsub.f32 1.0, %v1523_v50  ;;  %v1000_v49 = vmul.f32 %v1523_v50, %v1944_v37 }
 0x22a   : > { %v1005_v48 = vadd.f32 %v997_v46, %v989_v62  ;;  %v983_v52 = vsub.f32 1.0, %v1525_v13  ;;  %v999_v53 = vmul.f32 %v1525_v13, %v1939_v36 }
 0x22b   : > { %1014 = vst [vmem:[%s2052_s26 + $0x28] sm:$0xff] %v1006_v47 }
 0x22c   : > { %1013 = vst [vmem:[%s2052_s26 + $0x20] sm:$0xff] %v1005_v48 }
 0x230   : > { %v1527_v51 = vpop.eup %1526 }
 0x231   : > { %v1529_v35 = vpop.eup %1528  ;;  %v992_v34 = vmul.f32 %v1527_v51, %v984_v0 }
 0x232   : > { %v991_v42 = vmul.f32 %v1529_v35, %v983_v52 }
 0x233   : > { %v1008_v54 = vadd.f32 %v1000_v49, %v992_v34 }
 0x234   : > { %v1007_v55 = vadd.f32 %v999_v53, %v991_v42 }
 0x235   : > { %1016 = vst [vmem:[%s2052_s26 + $0x38] sm:$0xff] %v1008_v54 }
 0x236   : > { %1015 = vst [vmem:[%s2052_s26 + $0x30] sm:$0xff] %v1007_v55 }
 0x237   : > { %1543 = shalt.err (!%p1540_p3)
}
 0x238   : > { %s1544_s20 = scalar_lea.hbm %s2074_s11, 1024  ;;  %s1548_s18 = scalar_lea.hbm %s2129_s6, 2048 }
 0x239   : > { %p1545_p4 = scmp.ne.s32.totalorder %s2074_s11, %s1544_s20  ;;  %p1549_p9 = scmp.lt.u32.totalorder %s2074_s11, %s2129_s6 }
 0x23a   : > { %p1550_p10 = scmp.lt.u32.totalorder %s1548_s18, %s1544_s20  ;;  %p1552_p12 = scmp.lt.u32.totalorder %s1544_s20, %s2074_s11 }
 0x23b   : > { %p1546_p7 = pnand %p1545_p4, %p1671_p5 }
 0x23c   : > { %p1551_p11 = por %p1550_p10, %p1549_p9 }
 0x23d   : > { %p1547_p8 = pneg %p1546_p7 }
 0x23e   : > { %p1553_p13 = por %p1552_p12, %p1551_p11 }
 0x240   : > { %p1554_p0 = pnand %p1553_p13, %p1547_p8 }
 0x242   : > { %1557 = shalt.err (!%p1554_p0)
}
 0x243   : > { %s1596_s28 = smov 128   ;;  %s1597_s9 = smov 8  }
 0x244   : > { %1408 = dma.vmem_to_hbm [thread:$0]  (%p1671_p5), %s2076_s29, 1024, %s2074_s11, %s2082_s25, %s1596_s28, %s1596_s28, %s1597_s9  }
 0x245 PF: > { %p1414_p1 = scmp.ge.s32.totalorder %s1592_s24, 2  ;;  %s1046_s10 = sand.u32 1, %s1580_s21  }
 0x246   : > { %s1047_s13 = scalar_lea.sflag [#allocation3], %s1046_s10 }
 0x247   : > { %p1411_p2 = pnand %p1414_p1, %p1675_p6 }
 0x249   : > { %1575 = dma.done.wait (!%p1411_p2), %s1047_s13, 1024  }
 0x24a   : > { %1577 = vsyncadd (!%p1411_p2), %s1047_s13, 4294966272  ;;  %p16_p3 = scmp.ge.s32.totalorder %s1658_s27, 4   ;;  %s2132_s21 = smov %s1584_s22 }
 0x24b   : > { %s2133_s22 = smov %s1588_s23  ;;  %s2134_s23 = smov %s1669_s30 }
 0x24c   : > { %s2135_s24 = smov %s1658_s27  ;;  %18 = sbr.rel (!%p16_p3) target bundleno = 3 (0x3), region = 82 }
 0x253   :  { %1052 = vsyncpa [#allocation3], 1 }
 0x254   :  { %1054 = vsyncpa [#allocation3 + $0x1], 1 }

</bundles_post_ra>
